<compile_context>
chip_gen: v7x
topology: tpu7x:2x2x1
jax: 0.10.0
libtpu: 0.0.40
codegen_flags: <defaults>
</compile_context>

<pallas_src>
import functools
import math

import jax
import jax.numpy as jnp
from jax import lax
from jax.experimental import pallas as pl
from jax.experimental.pallas import tpu as pltpu

_MIB = 1024 * 1024


def _round_up(v: int, m: int) -> int:
    return ((v + m - 1) // m) * m


def _vmem_budget():
    """(per-x-tile byte budget, vmem_limit_bytes) chosen per TPU generation."""
    try:
        kind = jax.devices()[0].device_kind.lower()
    except Exception:
        kind = ""
    if "v7" in kind:
        return 5 * _MIB, 40 * _MIB    # v7x: only 64 MiB VMEM per TC -> stay well under
    if "v6" in kind:
        return 8 * _MIB, 48 * _MIB    # v6e: 128 MiB physical; raise the scoped limit
    if "v5" in kind:
        return 3 * _MIB, 24 * _MIB    # v5e: 16 MiB scoped default; raise explicitly
    return 2 * _MIB, 32 * _MIB        # unknown backend (e.g. CPU interpret)


def _choose_c_tile(Cg: int, Lg: int, itemsize: int, B: int, budget_bytes: int) -> int:
    """Channel tile: dtype-aware sublane multiple, never exceeds the tile budget."""
    m = {4: 8, 2: 16, 1: 32}.get(itemsize, 8)     # bf16 packs 16 rows/vreg, int8/fp8 pack 32
    row_bytes = max(1, Lg * itemsize)
    ct = budget_bytes // row_bytes
    if ct >= Cg:
        ct = Cg                                    # full extent is always legal
    else:
        ct = min(Cg, max(m, (ct // m) * m))        # multiple of the sublane packing
    # TODO(synk): split L as well when a single m-row tile already exceeds the budget.

    # v7x megacore: make sure the ("parallel","parallel") grid has >= ~4 steps.
    def steps(t):
        return B * ((Cg + t - 1) // t)

    while steps(ct) < 4 and ct > m:
        nxt = max(m, ((ct // 2) // m) * m)
        if nxt >= ct:
            break
        ct = nxt
    return ct


# ---------------------------------------------------------------------------
# Phase 1: batch-tiled keep-mask build (threshold + stride-1 max-pool dilation)
# ---------------------------------------------------------------------------
def _mask_kernel(u_ref, keep_ref, ksum_ref, *, gamma, block_size, B, bb, L):
    i = pl.program_id(0)
    # Bernoulli drop seeds + width-`block_size` dilation, expressed as an OR over
    # `block_size` statically shifted windows of the (padded) uniforms.  Padding
    # rows/columns hold 2.0 > gamma so they can never seed a drop.
    dropped = u_ref[:, 0:L] <= gamma
    for k in range(1, block_size):
        # TODO(synk): a log2-doubling composition would cut this to O(log block_size)
        # shifted maxima; negligible here since phase 1 is ~1/C of the total work.
        dropped = jnp.logical_or(dropped, u_ref[:, k:k + L] <= gamma)
    keep = 1.0 - dropped.astype(jnp.float32)       # (bb, L), 1 = keep
    keep_ref[...] = keep

    # Partial keep_sum (global normalization is applied in phase 2 from an SMEM
    # scalar, so phase 1 stays batch-tiled with a tiny VMEM working set).
    row = lax.broadcasted_iota(jnp.int32, keep.shape, 0) + i * bb
    part = jnp.sum(keep * (row < B).astype(jnp.float32), keepdims=True)   # (1, 1)

    @pl.when(i == 0)
    def _init():
        ksum_ref[...] = jnp.zeros_like(ksum_ref)

    ksum_ref[...] += part


# ---------------------------------------------------------------------------
# Phase 2: streaming apply, out = x * keep_mask * scale (broadcast over channels)
# ---------------------------------------------------------------------------
def _apply_kernel(scale_ref, mask_ref, x_ref, o_ref):
    # scale_ref: (1, 1) f32 in SMEM; mask_ref: (1, Lg) f32 keep mask for this batch row;
    # x_ref / o_ref: (c_tile, Lg).  Multiply in f32 so the normalization factor is
    # never quantized to the activation dtype; cast only on the final store.
    m = mask_ref[...] * scale_ref[0, 0]
    o_ref[...] = (x_ref[...].astype(jnp.float32) * m).astype(o_ref.dtype)


def dropblock1d(x, seed: int, *, proba: float, block_size: int, training: bool = True):
    """JAX/Pallas equivalent of DropBlock1D.forward (training mode). x: [B, C, L]."""
    assert 0.0 <= proba <= 1.0 and block_size > 0
    if (not training) or proba == 0.0:
        return x

    B, C, L = x.shape
    itemsize = jnp.dtype(x.dtype).itemsize
    gamma = proba / float(block_size ** 2)          # reference _compute_gamma formula

    # ---- phase 1: batch-tiled keep-mask build -----------------------------
    # Uniforms come from jax.random outside the kernel (portable; matches
    # torch.rand(...).le_(gamma) exactly).
    # TODO(synk): a TPU-only build could draw bits in-kernel with
    # pltpu.prng_random_bits to avoid materializing the uniforms in HBM.
    pad_l = block_size // 2
    Lw = L + block_size                              # room for the dilation window
    u = jax.random.uniform(jax.random.PRNGKey(seed), (B, L), dtype=jnp.float32)
    bb = min(_round_up(B, 8), max(8, (2 * _MIB // (Lw * 4)) // 8 * 8))
    Bp = _round_up(B, bb)
    u_pad = jnp.pad(u, ((0, Bp - B), (pad_l, Lw - L - pad_l)), constant_values=2.0)

    mask_kernel = functools.partial(
        _mask_kernel, gamma=gamma, block_size=block_size, B=B, bb=bb, L=L)
    keep, ksum = pl.pallas_call(
        mask_kernel,
        out_shape=(jax.ShapeDtypeStruct((Bp, L), jnp.float32),
                   jax.ShapeDtypeStruct((1, 1), jnp.float32)),
        grid=(Bp // bb,),
        in_specs=[pl.BlockSpec((bb, Lw), lambda i: (i, 0))],
        out_specs=(pl.BlockSpec((bb, L), lambda i: (i, 0)),
                   pl.BlockSpec((1, 1), lambda i: (0, 0))),
        compiler_params=pltpu.CompilerParams(dimension_semantics=("arbitrary",)),
    )(u_pad)
    keep = keep[:B]                                  # (B, L) keep mask, f32 in {0, 1}
    # out * numel / sum, numel of the torch (B,1,L) mask == B*L; clamp avoids 0/0
    # in the all-dropped case (output is all-zero anyway).
    scale = (jnp.float32(B * L) / jnp.maximum(ksum[0, 0], 1.0)).reshape(1, 1)

    # ---- phase 2: tiled, double-buffered, lane-dense apply -----------------
    # If L is not a multiple of 128, fold g consecutive channels onto the lane
    # axis so output stores are unmasked vst (biggest measured lever for
    # small/unaligned L).
    if L % 128 == 0:
        g = 1
    else:
        g = 128 // math.gcd(L, 128)
        if g > C or C % g != 0:
            g = 1   # TODO(synk): pad C (or L) so the lane-dense fold always applies.
    Cg, Lg = C // g, g * L
    x_r = x.reshape(B, Cg, Lg)
    mask_row = keep if g == 1 else jnp.tile(keep, (1, g))    # (B, Lg)
    mask_b = mask_row.reshape(B, 1, Lg)

    budget, vmem_limit = _vmem_budget()
    ct = _choose_c_tile(Cg, Lg, itemsize, B, budget)
    grid = (B, pl.cdiv(Cg, ct))               # clipped last tile is safe (elementwise)

    cost = pl.CostEstimate(
        flops=2 * B * C * L, transcendentals=0,
        bytes_accessed=2 * B * C * L * itemsize + B * Lg * 4)

    out = pl.pallas_call(
        _apply_kernel,
        out_shape=jax.ShapeDtypeStruct((B, Cg, Lg), x.dtype),
        grid=grid,
        in_specs=[
            pl.BlockSpec(memory_space=pltpu.MemorySpace.SMEM),        # scale (1,1)
            pl.BlockSpec((None, 1, Lg), lambda b, c: (b, 0, 0)),      # keep-mask row b
            pl.BlockSpec((None, ct, Lg), lambda b, c: (b, c, 0)),     # x tile
        ],
        out_specs=pl.BlockSpec((None, ct, Lg), lambda b, c: (b, c, 0)),
        compiler_params=pltpu.CompilerParams(
            dimension_semantics=("parallel", "parallel"),
            vmem_limit_bytes=vmem_limit),
        cost_estimate=cost,
    )(scale, mask_b, x_r)
    # TODO(synk): sweep pipeline_mode=pl.Buffered(3) on the x spec on v7x if the
    # DMA is still exposed after the larger tiles.
    return out.reshape(B, C, L)


# ---------------------------------------------------------------------------
# Pure-JAX reference (intended semantics of the PyTorch module) for testing.
# ---------------------------------------------------------------------------
def _reference(x, u, proba, block_size):
    B, C, L = x.shape
    gamma = proba / float(block_size ** 2)
    drop = (u <= gamma).astype(jnp.float32)
    pad = block_size // 2
    dpad = jnp.pad(drop, ((0, 0), (pad, block_size - pad)))
    pooled = jnp.zeros_like(drop)
    for k in range(block_size):
        pooled = jnp.maximum(pooled, dpad[:, k:k + L])
    keep = 1.0 - pooled
    scale = (B * L) / jnp.maximum(jnp.sum(keep), 1.0)
    return (x.astype(jnp.float32) * keep[:, None, :] * scale).astype(x.dtype)


if __name__ == "__main__":
    proba, block_size, seed = 0.3, 3, 0

    # Small NCL test (non-folded fallback layout: C < 128 // gcd(L, 128)).
    B, C, L = 2, 4, 16
    x = jax.random.normal(jax.random.PRNGKey(0), (B, C, L), dtype=jnp.float32)
    out = jax.block_until_ready(dropblock1d(x, seed, proba=proba, block_size=block_size))
    u = jax.random.uniform(jax.random.PRNGKey(seed), (B, L), dtype=jnp.float32)
    ref = _reference(x, u, proba, block_size)
    assert out.shape == x.shape and out.dtype == x.dtype
    assert bool(jnp.all(jnp.isfinite(out)))
    assert bool(jnp.allclose(out, ref, rtol=1e-5, atol=1e-5))

    # Lane-dense fold path (channels folded onto the lane axis: Lg = 128).
    B2, C2, L2 = 2, 16, 16
    x2 = jax.random.normal(jax.random.PRNGKey(1), (B2, C2, L2), dtype=jnp.float32)
    out2 = jax.block_until_ready(dropblock1d(x2, seed, proba=proba, block_size=block_size))
    u2 = jax.random.uniform(jax.random.PRNGKey(seed), (B2, L2), dtype=jnp.float32)
    ref2 = _reference(x2, u2, proba, block_size)
    assert bool(jnp.allclose(out2, ref2, rtol=1e-5, atol=1e-5))

    # Passthrough paths (eval mode / proba == 0).
    out_eval = jax.block_until_ready(
        dropblock1d(x, seed, proba=proba, block_size=block_size, training=False))
    assert bool(jnp.all(out_eval == x))
    out_p0 = jax.block_until_ready(
        dropblock1d(x, seed, proba=0.0, block_size=block_size))
    assert bool(jnp.all(out_p0 == x))

    print("KERNEL_OK")
</pallas_src>

<mosaic_0001>
module attributes {stable_mosaic.version = 11 : i64} {
  func.func @_mask_kernel(%arg0: i32, %arg1: memref<8x19xf32, #tpu.memory_space<vmem>>, %arg2: memref<8x16xf32, #tpu.memory_space<vmem>>, %arg3: memref<1x1xf32, #tpu.memory_space<vmem>>) attributes {dimension_semantics = [#tpu.dimension_semantics<arbitrary>], iteration_bounds = array<i64: 1>, scalar_prefetch = 0 : i64, scratch_operands = 0 : i64, tpu.core_type = #tpu.core_type<tc>, window_params = [{transform_indices = @transform_0, window_bounds = array<i64: 8, 19>}, {transform_indices = @transform_1, window_bounds = array<i64: 8, 16>}, {pipeline_mode = #tpu.pipeline_mode<synchronous>, transform_indices = @transform_2, window_bounds = array<i64: 1, 1>}]} {
    %c0 = arith.constant 0 : index
    %c0_0 = arith.constant 0 : index
    %0 = vector.load %arg1[%c0, %c0_0] : memref<8x19xf32, #tpu.memory_space<vmem>>, vector<8x16xf32>
    %cst = arith.constant 0.0333333351 : f32
    %1 = vector.broadcast %cst : f32 to vector<8x16xf32>
    %2 = arith.cmpf ole, %0, %1 : vector<8x16xf32>
    %c0_1 = arith.constant 0 : index
    %c1 = arith.constant 1 : index
    %3 = vector.load %arg1[%c0_1, %c1] : memref<8x19xf32, #tpu.memory_space<vmem>>, vector<8x16xf32>
    %cst_2 = arith.constant 0.0333333351 : f32
    %4 = vector.broadcast %cst_2 : f32 to vector<8x16xf32>
    %5 = arith.cmpf ole, %3, %4 : vector<8x16xf32>
    %6 = arith.ori %2, %5 : vector<8x16xi1>
    %c0_3 = arith.constant 0 : index
    %c2 = arith.constant 2 : index
    %7 = vector.load %arg1[%c0_3, %c2] : memref<8x19xf32, #tpu.memory_space<vmem>>, vector<8x16xf32>
    %cst_4 = arith.constant 0.0333333351 : f32
    %8 = vector.broadcast %cst_4 : f32 to vector<8x16xf32>
    %9 = arith.cmpf ole, %7, %8 : vector<8x16xf32>
    %10 = arith.ori %6, %9 : vector<8x16xi1>
    %11 = arith.extui %10 : vector<8x16xi1> to vector<8x16xi32>
    %12 = arith.sitofp %11 : vector<8x16xi32> to vector<8x16xf32>
    %cst_5 = arith.constant 1.000000e+00 : f32
    %13 = vector.broadcast %cst_5 : f32 to vector<8x16xf32>
    %14 = arith.subf %13, %12 : vector<8x16xf32>
    %c0_6 = arith.constant 0 : index
    %c0_7 = arith.constant 0 : index
    %15 = vector.load %arg2[%c0_6, %c0_7] : memref<8x16xf32, #tpu.memory_space<vmem>>, vector<8x16xf32>
    tpu.vector_store %arg2[%c0_6, %c0_7], %14 {strides = array<i32>} : memref<8x16xf32, #tpu.memory_space<vmem>>, vector<8x16xf32>,
    %16 = tpu.iota {dimensions = array<i32: 0>} : vector<8x16xi32>
    %c8_i32 = arith.constant 8 : i32
    %17 = arith.muli %arg0, %c8_i32 : i32
    %18 = vector.broadcast %17 : i32 to vector<8x16xi32>
    %19 = arith.addi %16, %18 : vector<8x16xi32>
    %c2_i32 = arith.constant 2 : i32
    %20 = vector.broadcast %c2_i32 : i32 to vector<8x16xi32>
    %21 = arith.cmpi slt, %19, %20 : vector<8x16xi32>
    %22 = arith.extui %21 : vector<8x16xi1> to vector<8x16xi32>
    %23 = arith.sitofp %22 : vector<8x16xi32> to vector<8x16xf32>
    %24 = arith.mulf %14, %23 : vector<8x16xf32>
    %25 = vector.shape_cast %24 : vector<8x16xf32> to vector<1x8x16xf32>
    %cst_8 = arith.constant dense<0.000000e+00> : vector<1xf32>
    %26 = vector.multi_reduction <add>, %25, %cst_8 [1, 2] : vector<1x8x16xf32> to vector<1xf32>
    %27 = vector.shape_cast %26 : vector<1xf32> to vector<1x1x1xf32>
    %28 = vector.extract %27[0, 0, 0] : f32 from vector<1x1x1xf32>
    %29 = vector.broadcast %28 : f32 to vector<1x1xf32>
    %c0_i32 = arith.constant 0 : i32
    %30 = arith.cmpi eq, %arg0, %c0_i32 : i32
    %31 = arith.extui %30 : i1 to i32
    %c0_i32_9 = arith.constant 0 : i32
    %32 = arith.cmpi ne, %31, %c0_i32_9 : i32
    scf.if %32 {
      %cst_14 = arith.constant 0.000000e+00 : f32
      %36 = vector.broadcast %cst_14 : f32 to vector<1x1xf32>
      %c0_15 = arith.constant 0 : index
      %c0_16 = arith.constant 0 : index
      %37 = vector.load %arg3[%c0_15, %c0_16] : memref<1x1xf32, #tpu.memory_space<vmem>>, vector<1x1xf32>
      tpu.vector_store %arg3[%c0_15, %c0_16], %36 {strides = array<i32>} : memref<1x1xf32, #tpu.memory_space<vmem>>, vector<1x1xf32>,
    } else {
    }
    %c0_10 = arith.constant 0 : index
    %c0_11 = arith.constant 0 : index
    %33 = vector.load %arg3[%c0_10, %c0_11] : memref<1x1xf32, #tpu.memory_space<vmem>>, vector<1x1xf32>
    %34 = arith.addf %33, %29 : vector<1x1xf32>
    %c0_12 = arith.constant 0 : index
    %c0_13 = arith.constant 0 : index
    %35 = vector.load %arg3[%c0_12, %c0_13] : memref<1x1xf32, #tpu.memory_space<vmem>>, vector<1x1xf32>
    tpu.vector_store %arg3[%c0_12, %c0_13], %34 {strides = array<i32>} : memref<1x1xf32, #tpu.memory_space<vmem>>, vector<1x1xf32>,
    return
  }
  func.func @transform_0(%arg0: i32) -> (i32, i32) {
    %c0_i32 = arith.constant 0 : i32
    %c0_i32_0 = arith.constant 0 : i32
    return %arg0, %c0_i32 : i32, i32
  }
  func.func @transform_1(%arg0: i32) -> (i32, i32) {
    %c0_i32 = arith.constant 0 : i32
    %c0_i32_0 = arith.constant 0 : i32
    return %arg0, %c0_i32 : i32, i32
  }
  func.func @transform_2(%arg0: i32) -> (i32, i32) {
    %c0_i32 = arith.constant 0 : i32
    %c0_i32_0 = arith.constant 0 : i32
    %c0_i32_1 = arith.constant 0 : i32
    return %c0_i32, %c0_i32_0 : i32, i32
  }
}

</mosaic_0001>

<bundles_post_ra>
// kernel: tpu_custom_call.1
= control target key start
LH: loop header
LB: loop body
LE: loop exit
PB: predicated region body
PF: predicated region fallthrough
CT: control target
= control target key end

     0   :  { %8 = vsyncpa [#allocation3], 0  ;;  %s242_s0 = inlined_call_operand.hbm [shape: f32[8,19], index: 0, kind: input, shape index: {}]   ;;  %s243_s1 = inlined_call_operand.hbm [shape: f32[8,16], index: 1, kind: output, shape index: {0}]   ;;  %s244_s2 = inlined_call_operand.hbm [shape: f32[1,1], index: 2, kind: output, shape index: {1}]  }
   0x1   :  { %9 = vsyncpa [#allocation4], 0 }
   0x2   :  { %10 = vsyncpa [#allocation7], 0  ;;  %s182_s9 = smov [#allocation2]   ;;  %s110_s13 = scalar_lea.hbm %s242_s0, 128 }
   0x3   :  { %s17_s10 = sshll.u32 %s182_s9, 4  ;;  %p111_p0 = scmp.ne.s32.totalorder %s242_s0, %s110_s13  ;;  %s18_s10 = int_to_ptr.vmem [resolvable:$true] %s17_s10 }
   0x4   :  { %p114_p1 = scmp.lt.u32.totalorder %s110_s13, %s242_s0 }
   0x6   :  { %p116_p2 = pnand %p114_p1, %p111_p0 }
   0x8   :  { %119 = shalt.err (!%p116_p2)
}
   0x9   :  { %s120_s18 = scalar_lea.vmem %s18_s10, 128  ;;  %p125_p4 = scmp.lt.s32.totalorder %s18_s10, %s18_s10 }
   0xa   :  { %p121_p3 = scmp.ne.s32.totalorder %s18_s10, %s120_s18  ;;  %p126_p5 = scmp.lt.s32.totalorder %s120_s18, %s120_s18 }
   0xc   :  { %p127_p6 = por %p126_p5, %p125_p4 }
   0xe   :  { %p128_p7 = pnand %p127_p6, %p121_p3 }
  0x10   :  { %131 = shalt.err (!%p128_p7)
}
  0x11   :  { %20 = dma.hbm_to_vmem [thread:$0]  %s242_s0, 128, %s18_s10, [#allocation3]  }
  0x12   :  { %176 = dma.done.wait [#allocation3], 128  }
  0x13   :  { %177 = vsyncadd [#allocation3], 4294967168  ;;  %vm64_vm0 = vcmask 0   ;;  %v183_v0 = vmov 0.0   ;;  %v24_v1 = vld [vmem:[#allocation2] sm:$0xff]  ;;  %v184_v2 = vmov 0   ;;  %v40_v4 = vlaneseq }
  0x14   :  { %65 = vst.msk [vmem:[#allocation6] sm:$0x1] %vm64_vm0, %v183_v0  ;;  %vm25_vm1 = vcmp.le.f32.partialorder %v24_v1, 0.033333335  ;;  %s185_s21 = smov 127   ;;  %s186_s22 = smov 126  }
  0x15   :  { %v26_v3 = vsel %vm25_vm1, 1, %v184_v2  ;;  %v41_v6 = vshrl.u32 %v40_v4, 7  ;;  %vm38_vm7 = vcmask 130048   ;;  %s187_s0 = smov [#allocation5]  }
  0x16   :  { %27 = vrot.lane.b32.xlu0 %v26_v3, %s185_s21  ;;  %s76_s23 = sshll.u32 %s187_s0, 4  ;;  %s77_s23 = int_to_ptr.vmem [resolvable:$true] %s76_s23 }
  0x17   :  { %vm45_vm3 = vcmp.lt.s32.totalorder %v41_v6, 2  ;;  %s132_s24 = scalar_lea.vmem %s77_s23, 128  ;;  %p137_p9 = scmp.lt.s32.totalorder %s77_s23, %s77_s23 }
  0x18   :  { %v100_v9 = vsel %vm45_vm3, 1.0, %v183_v0  ;;  %p133_p8 = scmp.ne.s32.totalorder %s77_s23, %s132_s24  ;;  %p138_p10 = scmp.lt.s32.totalorder %s132_s24, %s132_s24 }
  0x1a   :  { %31 = vrot.lane.b32.xlu0 %v26_v3, %s186_s22  ;;  %p139_p11 = por %p138_p10, %p137_p9 }
  0x1c   :  { %p140_p12 = pnand %p139_p11, %p133_p8 }
  0x88   :  { %v28_v5 = vpop.permute.xlu0 %27 }
  0x89   :  { %vm29_vm2 = vcmp.ne.s32.totalorder %v28_v5, 0 }
  0x8a   :  { %vm30_vm4 = vmor %vm25_vm1, %vm29_vm2 }
  0x8c   :  { %v32_v7 = vpop.permute.xlu0 %31 }
  0x8d   :  { %vm33_vm5 = vcmp.ne.s32.totalorder %v32_v7, 0 }
  0x8e   :  { %vm34_vm6 = vmor %vm30_vm4, %vm33_vm5 }
  0x8f   :  { %v99_v8 = vsel %vm34_vm6, 1.0, %v183_v0 }
  0x90   :  { %v37_v10 = vsub.f32 1.0, %v99_v8 }
  0x92   :  { %v48_v11 = vmul.f32 %v100_v9, %v37_v10  ;;  %39 = vst.msk [vmem:[#allocation5] sm:$0xff] %vm38_vm7, %v37_v10 }
  0x94   :  { %v49_v12 = vsel %vm38_vm7, %v48_v11, 0.0 }
  0x95   :  { %50 = vadd.xlane.f32.xlu1 %v49_v12 }
  0x96   :  { %143 = shalt.err (!%p140_p12)
}
  0x97   :  { %s144_s27 = scalar_lea.hbm %s243_s1, 128 }
  0x98   :  { %p145_p13 = scmp.ne.s32.totalorder %s243_s1, %s144_s27  ;;  %p148_p0 = scmp.lt.u32.totalorder %s144_s27, %s243_s1 }
  0x9a   :  { %p150_p1 = pnand %p148_p0, %p145_p13 }
  0x9c   :  { %153 = shalt.err (!%p150_p1)
}
  0x9d   :  { %79 = dma.vmem_to_hbm [thread:$0]  %s77_s23, 128, %s243_s1, [#allocation4]   ;;  %v66_v20 = vld [vmem:[#allocation6] sm:$0x1] }
  0x9e   :  { %s188_s6 = smov [#allocation6]  }
  0x9f   :  { %s86_s7 = sshll.u32 %s188_s6, 4  ;;  %s87_s7 = int_to_ptr.vmem [resolvable:$true] %s86_s7 }
  0xa0   :  { %s154_s9 = scalar_lea.vmem %s87_s7, 16  ;;  %s158_s1 = scalar_lea.vmem %s87_s7, 32 }
  0xa1   :  { %p155_p2 = scmp.ne.s32.totalorder %s87_s7, %s154_s9  ;;  %p159_p3 = scmp.lt.s32.totalorder %s87_s7, %s87_s7 }
  0xa2   :  { %p160_p4 = scmp.lt.s32.totalorder %s158_s1, %s154_s9 }
  0xa4   :  { %p161_p5 = por %p160_p4, %p159_p3 }
  0xa6   :  { %p162_p6 = pnand %p161_p5, %p155_p2 }
 0x122   :  { %v51_v13 = vpop.xlane.xlu1 %50 }
 0x123   :  { %v52_v14 = vrot.slane %v51_v13, 4 }
 0x125   :  { %v53_v15 = vadd.f32 %v52_v14, %v51_v13 }
 0x127   :  { %v54_v16 = vrot.slane %v53_v15, 2 }
 0x129   :  { %v55_v17 = vadd.f32 %v54_v16, %v53_v15 }
 0x12b   :  { %v56_v18 = vrot.slane %v55_v17, 1 }
 0x12d   :  { %v57_v19 = vadd.f32 %v56_v18, %v55_v17 }
 0x12f   :  { %101 = vpush %v57_v19 }
 0x160   :  { %s102_s8 = spop %101 }
 0x161   :  { %v59_v21 = vstv %s102_s8 }
 0x162   :  { %v67_v22 = vadd.f32 %v66_v20, %v59_v21 }
 0x164   :  { %69 = vst.msk [vmem:[#allocation6] sm:$0x1] %vm64_vm0, %v67_v22 }
 0x165   :  { %165 = shalt.err (!%p162_p6)
}
 0x166   :  { %s166_s12 = scalar_lea.hbm %s244_s2, 16 }
 0x167   :  { %p167_p7 = scmp.ne.s32.totalorder %s244_s2, %s166_s12  ;;  %p170_p8 = scmp.lt.u32.totalorder %s166_s12, %s244_s2 }
 0x169   :  { %p172_p9 = pnand %p170_p8, %p167_p7 }
 0x16b   :  { %175 = shalt.err (!%p172_p9)
}
 0x16c   :  { %89 = dma.vmem_to_hbm [thread:$0]  %s87_s7, 16, %s244_s2, [#allocation7]  }
 0x16d   :  { %178 = dma.done.wait [#allocation4], 128  }
 0x16e   :  { %179 = vsyncadd [#allocation4], 4294967168 }
 0x16f   :  { %180 = dma.done.wait [#allocation7], 16  }
 0x170   :  { %181 = vsyncadd [#allocation7], 4294967280 }
 0x171   :  { %96 = vsyncpa [#allocation3], 1 }
 0x172   :  { %97 = vsyncpa [#allocation4], 1 }
 0x173   :  { %98 = vsyncpa [#allocation7], 1 }

</bundles_post_ra>
